<compile_context>
chip_gen: v5e
topology: v5e:2x2
jax: 0.10.0
libtpu: 0.0.40
codegen_flags: <defaults>
</compile_context>

<pallas_src>
import functools

import jax
import jax.numpy as jnp
from jax.experimental import pallas as pl
from jax.experimental.pallas import tpu as pltpu


def _rmsnorm_kernel(x_ref, w_ref, o_ref, *, eps, inv_h):
    # x_ref: (row_tile, H) tile of rows; w_ref: (1, H) weight; o_ref: (row_tile, H)
    x = x_ref[...].astype(jnp.float32)
    var = jnp.sum(x * x, axis=-1, keepdims=True) * inv_h   # 1/H constant-folded
    inv = jax.lax.rsqrt(var + eps)                          # EUP slot, ~free
    # Match Llama/PyTorch: cast normalized activations back to input dtype,
    # then multiply by weight (single cast into the output dtype at the store).
    normed = (x * inv).astype(x_ref.dtype)
    o_ref[...] = (w_ref[...] * normed).astype(o_ref.dtype)


def _sublane_packing(dtype) -> int:
    itemsize = jnp.dtype(dtype).itemsize
    return 8 * max(1, 4 // itemsize)        # 8 for f32, 16 for bf16, 32 for int8/fp8


def _choose_row_tile(rows: int, hidden: int, dtype) -> int:
    """Pick a row tile giving ~4 MiB input blocks (2–6 MiB band), multiple of the
    sublane packing, and no larger than the (rounded-up) row count."""
    itemsize = jnp.dtype(dtype).itemsize
    packing = _sublane_packing(dtype)
    row_bytes = hidden * itemsize

    target_bytes = 4 << 20                  # ~4 MiB per input tile
    max_bytes = 6 << 20                     # keep double-buffered in+out < ~24 MiB (v7x-safe)

    rt = max(packing, (target_bytes // max(row_bytes, 1)) // packing * packing)
    while rt > packing and rt * row_bytes > max_bytes:
        rt -= packing

    rows_up = -(-rows // packing) * packing  # don't make blocks bigger than the data
    return max(packing, min(rt, rows_up))


def rms_norm(hidden_states, weight, eps=1e-6, *, row_tile=None):
    """hidden_states: [..., H]; weight: [H].

    Output dtype follows jnp promotion of (weight, input) like the PyTorch
    module's final `weight * x.to(input_dtype)`.
    """
    orig_shape = hidden_states.shape
    H = orig_shape[-1]
    x2d = hidden_states.reshape(-1, H)
    R = x2d.shape[0]

    in_dtype = x2d.dtype
    out_dtype = jnp.result_type(weight.dtype, in_dtype)

    if row_tile is None:
        row_tile = _choose_row_tile(R, H, in_dtype)
    else:
        # Keep user overrides aligned to the sublane packing.
        packing = _sublane_packing(in_dtype)
        row_tile = max(packing, (row_tile // packing) * packing)

    w2d = weight.reshape(1, H)

    # Explicit scoped-VMEM budget: double-buffered input + output tiles + weight,
    # plus slack. Needed on v5e (16 MiB default); well under v7x's 64 MiB physical.
    tile_in_bytes = row_tile * H * jnp.dtype(in_dtype).itemsize
    tile_out_bytes = row_tile * H * jnp.dtype(out_dtype).itemsize
    w_bytes = H * jnp.dtype(weight.dtype).itemsize
    vmem_bytes = 2 * (tile_in_bytes + tile_out_bytes) + 2 * w_bytes + (2 << 20)
    vmem_bytes = int(min(max(vmem_bytes, 16 << 20), 48 << 20))

    grid = (pl.cdiv(R, row_tile),)  # ragged last block is masked by Pallas; no host padding

    kernel = functools.partial(_rmsnorm_kernel, eps=eps, inv_h=1.0 / H)

    out = pl.pallas_call(
        kernel,
        out_shape=jax.ShapeDtypeStruct((R, H), out_dtype),
        grid_spec=pltpu.PrefetchScalarGridSpec(
            num_scalar_prefetch=0,
            grid=grid,
            in_specs=[
                pl.BlockSpec((row_tile, H), lambda i: (i, 0)),
                pl.BlockSpec((1, H), lambda i: (0, 0)),
            ],
            out_specs=pl.BlockSpec((row_tile, H), lambda i: (i, 0)),
        ),
        compiler_params=pltpu.CompilerParams(
            dimension_semantics=("parallel",),   # megacore sharding on v7x
            vmem_limit_bytes=vmem_bytes,
        ),
    )(x2d, w2d)

    return out.reshape(orig_shape[:-1] + (H,)).astype(out_dtype)


def rms_norm_ref(hidden_states, weight, eps=1e-6):
    input_dtype = hidden_states.dtype
    x = hidden_states.astype(jnp.float32)
    var = jnp.mean(x * x, axis=-1, keepdims=True)
    x = x * jax.lax.rsqrt(var + eps)
    return weight * x.astype(input_dtype)


if __name__ == "__main__":
    key = jax.random.PRNGKey(0)
    batch, seq, hidden = 2, 8, 128
    x = jax.random.normal(key, (batch, seq, hidden), dtype=jnp.float32)

    # Deterministic parameter init (module __init__: ones of shape [hidden]).
    weight = jnp.ones((hidden,), dtype=jnp.float32)

    out = rms_norm(x, weight, eps=1e-6)
    out = jax.block_until_ready(out)

    ref = rms_norm_ref(x, weight, eps=1e-6)
    assert out.shape == x.shape and out.dtype == ref.dtype
    assert jnp.allclose(out, ref, atol=1e-5, rtol=1e-5)

    # Also exercise a ragged row count (R % row_tile != 0) to confirm the
    # cdiv-grid masking path is correct.
    x2 = jax.random.normal(jax.random.PRNGKey(1), (3, 7, hidden), dtype=jnp.float32)
    out2 = jax.block_until_ready(rms_norm(x2, weight, eps=1e-6))
    assert jnp.allclose(out2, rms_norm_ref(x2, weight, eps=1e-6), atol=1e-5, rtol=1e-5)

    print("KERNEL_OK")
</pallas_src>

<mosaic_0001>
module attributes {stable_mosaic.version = 11 : i64} {
  func.func @_rmsnorm_kernel(%arg0: i32, %arg1: memref<16x128xf32, #tpu.memory_space<vmem>>, %arg2: memref<1x128xf32, #tpu.memory_space<vmem>>, %arg3: memref<16x128xf32, #tpu.memory_space<vmem>>) attributes {dimension_semantics = [#tpu.dimension_semantics<parallel>], iteration_bounds = array<i64: 1>, scalar_prefetch = 0 : i64, scratch_operands = 0 : i64, tpu.core_type = #tpu.core_type<tc>, window_params = [{transform_indices = @transform_0, window_bounds = array<i64: 16, 128>}, {pipeline_mode = #tpu.pipeline_mode<synchronous>, transform_indices = @transform_1, window_bounds = array<i64: 1, 128>}, {transform_indices = @transform_2, window_bounds = array<i64: 16, 128>}]} {
    %c0 = arith.constant 0 : index
    %c0_0 = arith.constant 0 : index
    %0 = vector.load %arg1[%c0, %c0_0] : memref<16x128xf32, #tpu.memory_space<vmem>>, vector<16x128xf32>
    %1 = arith.mulf %0, %0 : vector<16x128xf32>
    %cst = arith.constant dense<0.000000e+00> : vector<16xf32>
    %2 = vector.multi_reduction <add>, %1, %cst [1] : vector<16x128xf32> to vector<16xf32>
    %3 = vector.shape_cast %2 : vector<16xf32> to vector<16x1xf32>
    %cst_1 = arith.constant 7.812500e-03 : f32
    %4 = vector.broadcast %cst_1 : f32 to vector<16x1xf32>
    %5 = arith.mulf %3, %4 : vector<16x1xf32>
    %cst_2 = arith.constant 9.99999997E-7 : f32
    %6 = vector.broadcast %cst_2 : f32 to vector<16x1xf32>
    %7 = arith.addf %5, %6 : vector<16x1xf32>
    %8 = math.rsqrt %7 : vector<16x1xf32>
    %9 = vector.broadcast %8 : vector<16x1xf32> to vector<16x128xf32>
    %10 = arith.mulf %0, %9 : vector<16x128xf32>
    %c0_3 = arith.constant 0 : index
    %c0_4 = arith.constant 0 : index
    %11 = vector.load %arg2[%c0_3, %c0_4] : memref<1x128xf32, #tpu.memory_space<vmem>>, vector<1x128xf32>
    %12 = vector.broadcast %11 : vector<1x128xf32> to vector<16x128xf32>
    %13 = arith.mulf %12, %10 : vector<16x128xf32>
    %c0_5 = arith.constant 0 : index
    %c0_6 = arith.constant 0 : index
    %14 = vector.load %arg3[%c0_5, %c0_6] : memref<16x128xf32, #tpu.memory_space<vmem>>, vector<16x128xf32>
    tpu.vector_store %arg3[%c0_5, %c0_6], %13 {strides = array<i32>} : memref<16x128xf32, #tpu.memory_space<vmem>>, vector<16x128xf32>,
    return
  }
  func.func @transform_0(%arg0: i32) -> (i32, i32) {
    %c0_i32 = arith.constant 0 : i32
    %c0_i32_0 = arith.constant 0 : i32
    return %arg0, %c0_i32 : i32, i32
  }
  func.func @transform_1(%arg0: i32) -> (i32, i32) {
    %c0_i32 = arith.constant 0 : i32
    %c0_i32_0 = arith.constant 0 : i32
    %c0_i32_1 = arith.constant 0 : i32
    return %c0_i32, %c0_i32_0 : i32, i32
  }
  func.func @transform_2(%arg0: i32) -> (i32, i32) {
    %c0_i32 = arith.constant 0 : i32
    %c0_i32_0 = arith.constant 0 : i32
    return %arg0, %c0_i32 : i32, i32
  }
}

</mosaic_0001>

<bundles_post_ra>
// kernel: tpu_custom_call.1
= control target key start
LH: loop header
LB: loop body
LE: loop exit
PB: predicated region body
PF: predicated region fallthrough
CT: control target
= control target key end

     0   :  { %7 = vsyncpa [#allocation3], 0  ;;  %s227_s0 = inlined_call_operand.hbm [shape: f32[16,128], index: 0, kind: input, shape index: {}]   ;;  %s228_s1 = inlined_call_operand.hbm [shape: f32[1,128], index: 1, kind: input, shape index: {}]   ;;  %s229_s2 = inlined_call_operand.hbm [shape: f32[16,128], index: 2, kind: output, shape index: {}]  }
   0x1   :  { %8 = vsyncpa [#allocation6], 0 }
   0x2   :  { %9 = vsyncpa [#allocation4], 0  ;;  %s14_s11 = sshll.u32 %s227_s0, 4  ;;  %s192_s12 = smov [#allocation2]   ;;  %s15_s11 = int_to_ptr.hbm [resolvable:$true] %s14_s11 }
   0x3   :  { %s16_s13 = sshll.u32 %s192_s12, 4  ;;  %s28_s16 = sshll.u32 %s228_s1, 4  ;;  %s17_s13 = int_to_ptr.vmem [resolvable:$true] %s16_s13  ;;  %s29_s16 = int_to_ptr.hbm [resolvable:$true] %s28_s16 }
   0x4   :  { %s193_s17 = smov 128   ;;  %s194_s18 = smov 8  }
   0x5   :  { %22 = dma.hbm_to_vmem [thread:$0]  %s15_s11, 256, %s17_s13, [#allocation3], %s193_s17, %s193_s17, %s194_s18  }
   0x6   :  { %s195_s19 = smov [#allocation5]  }
   0x7   :  { %s30_s20 = sshll.u32 %s195_s19, 4  ;;  %s31_s20 = int_to_ptr.vmem [resolvable:$true] %s30_s20 }
   0x8   :  { %33 = dma.hbm_to_vmem [thread:$0]  %s29_s16, 16, %s31_s20, [#allocation6]  }
   0x9   :  { %186 = dma.done.wait [#allocation3], 256  }
   0xa   :  { %187 = vsyncadd [#allocation3], 4294967040 }
   0xb   :  { %188 = dma.done.wait [#allocation6], 16  }
   0xc   :  { %189 = vsyncadd [#allocation6], 4294967280  ;;  %v42_v0 = vld [vmem:[#allocation2] sm:$0xff]  ;;  %v43_v2 = vld [vmem:[#allocation2 + $0x8] sm:$0xff]  ;;  %s196_s0 = smov [#allocation7]   ;;  %s90_s23 = sshll.u32 %s229_s2, 4  ;;  %s91_s23 = int_to_ptr.hbm [resolvable:$true] %s90_s23 }
   0xd   :  { %v44_v1 = vmul.f32 %v42_v0, %v42_v0  ;;  %v45_v3 = vmul.f32 %v43_v2, %v43_v2  ;;  %v109_v18 = vld [vmem:[#allocation5] ss:$0 sm:$0xff]  ;;  %s88_s1 = sshll.u32 %s196_s0, 4  ;;  %s89_s1 = int_to_ptr.vmem [resolvable:$true] %s88_s1 }
   0xf   :  { %46 = vadd.xlane.f32.xlu0 %v44_v1 }
  0x17   :  { %48 = vadd.xlane.f32.xlu0 %v45_v3 }
  0x82   :  { %v47_v4 = vpop.xlane.xlu0 %46 }
  0x83   :  { %v50_v5 = vmul.f32 0.0078125, %v47_v4 }
  0x85   :  { %v52_v6 = vadd.f32 1e-06, %v50_v5 }
  0x87   :  { %110 = vrsqrt.f32 %v52_v6  ;;  %vm60_vm1 = vweird.f32 %v52_v6 }
  0x8a   :  { %v49_v7 = vpop.xlane.xlu0 %48 }
  0x8b   :  { %v51_v8 = vmul.f32 0.0078125, %v49_v7 }
  0x8d   :  { %v111_v9 = vpop.eup %110  ;;  %v53_v10 = vadd.f32 1e-06, %v51_v8 }
  0x8e   :  { %v55_v11 = vmul.f32 %v111_v9, %v52_v6  ;;  %vm61_vm0 = vweird.f32 %v111_v9 }
  0x8f   :  { %112 = vrsqrt.f32 %v53_v10  ;;  %vm62_vm2 = vmor %vm60_vm1, %vm61_vm0  ;;  %vm70_vm4 = vweird.f32 %v53_v10 }
  0x90   :  { %v56_v12 = vmul.f32 %v111_v9, %v55_v11 }
  0x92   :  { %v57_v13 = vmul.f32 0.5, %v56_v12 }
  0x94   :  { %v58_v14 = vsub.f32 1.5, %v57_v13 }
  0x95   :  { %v113_v15 = vpop.eup %112 }
  0x96   :  { %v59_v16 = vmul.f32 %v111_v9, %v58_v14  ;;  %v65_v17 = vmul.f32 %v113_v15, %v53_v10  ;;  %vm71_vm3 = vweird.f32 %v113_v15 }
  0x97   :  { %vm72_vm5 = vmor %vm70_vm4, %vm71_vm3 }
  0x98   :  { %v63_v19 = vsel %vm62_vm2, %v111_v9, %v59_v16  ;;  %v66_v20 = vmul.f32 %v113_v15, %v65_v17 }
  0x99   :  { %v74_v21 = vmul.f32 %v63_v19, %v42_v0 }
  0x9a   :  { %v67_v22 = vmul.f32 0.5, %v66_v20 }
  0x9b   :  { %v80_v23 = vmul.f32 %v109_v18, %v74_v21 }
  0x9c   :  { %v68_v24 = vsub.f32 1.5, %v67_v22 }
  0x9d   :  { %82 = vst [vmem:[#allocation7] sm:$0xff] %v80_v23 }
  0x9e   :  { %v69_v25 = vmul.f32 %v113_v15, %v68_v24 }
  0xa0   :  { %v73_v26 = vsel %vm72_vm5, %v113_v15, %v69_v25 }
  0xa1   :  { %v75_v27 = vmul.f32 %v73_v26, %v43_v2 }
  0xa3   :  { %v81_v28 = vmul.f32 %v109_v18, %v75_v27 }
  0xa5   :  { %83 = vst [vmem:[#allocation7 + $0x8] sm:$0xff] %v81_v28 }
  0xa6   :  { %96 = dma.vmem_to_hbm [thread:$0]  %s89_s1, 256, %s91_s23, [#allocation4], %s193_s17, %s193_s17, %s194_s18  }
  0xa7   :  { %190 = dma.done.wait [#allocation4], 256  }
  0xa8   :  { %191 = vsyncadd [#allocation4], 4294967040 }
  0xa9   :  { %101 = vsyncpa [#allocation3], 1 }
  0xaa   :  { %102 = vsyncpa [#allocation6], 1 }
  0xab   :  { %103 = vsyncpa [#allocation4], 1 }

</bundles_post_ra>
